<compile_context>
chip_gen: v5e
topology: v5e:2x2
jax: 0.10.0
libtpu: 0.0.40
codegen_flags: <defaults>
</compile_context>

<pallas_src>
import jax
import jax.numpy as jnp
from jax import lax
from jax.experimental import pallas as pl
from jax.experimental.pallas import tpu as pltpu


def _round_up(v, m):
    return (v + m - 1) // m * m


def mlp_kernel(x_ref, w1_ref, b1_ref, w2_ref, b2_ref, w3t_ref, b3_ref, ot_ref):
    # x tile arrives as f32 straight from HBM; cast in-register for the MXU.
    x = x_ref[...].astype(jnp.bfloat16)

    # Layer 1: bf16 x @ bf16 W1 -> f32 accumulate, + bias, ReLU, -> bf16.
    h1 = jnp.dot(x, w1_ref[...], preferred_element_type=jnp.float32)
    h1 = jnp.maximum(h1 + b1_ref[...], 0.0).astype(jnp.bfloat16)

    # Layer 2: bf16 x bf16 -> f32 accumulate, + bias, ReLU, -> bf16.
    h2 = jnp.dot(h1, w2_ref[...], preferred_element_type=jnp.float32)
    h2 = jnp.maximum(h2 + b2_ref[...], 0.0).astype(jnp.bfloat16)

    # Layer 3 computed directly in transposed form:
    #   out_t[o, b] = sum_k w3t[o, k] * h2[b, k]    ->  [out_size, tb]
    # so the HBM store is lane-dense (lane dim = batch tile), no masked vst.
    out_t = lax.dot_general(
        w3t_ref[...], h2,
        dimension_numbers=(((1,), (1,)), ((), ())),
        preferred_element_type=jnp.float32)
    ot_ref[...] = (out_t + b3_ref[...]).astype(ot_ref.dtype)


def network_forward(x, params, *, block_b=4096):
    """x: [B, input_size] float32. Returns [B, output_size] float32."""
    # Weights in [in, out] layout; layer-3 weight is used as [out, in] so the
    # kernel can emit the transposed (lane-dense) output directly.
    w1 = params["w1"].astype(jnp.bfloat16)           # [in, h1]
    w2 = params["w2"].astype(jnp.bfloat16)           # [h1, h2]
    w3t = params["w3"].T.astype(jnp.bfloat16)        # [out, h2]
    b1 = params["b1"].reshape(1, -1).astype(jnp.float32)   # [1, h1]
    b2 = params["b2"].reshape(1, -1).astype(jnp.float32)   # [1, h2]
    b3 = params["b3"].reshape(-1, 1).astype(jnp.float32)   # [out, 1]

    B, in_size = x.shape
    h1_size, h2_size = w1.shape[1], w2.shape[1]
    out_size = w3t.shape[0]

    # Batch tile selection:
    #  * B < 256: single tile, tb == padded B (multiple of 8 sublanes).
    #  * otherwise: >=2 (even) tiles so v7x's two cores both get work; tiles
    #    are multiples of 128 so the transposed output block is lane-aligned.
    if B < 256:
        tb = _round_up(max(B, 8), 8)
    else:
        n_target = max(2, 2 * pl.cdiv(B, 2 * block_b))   # even, best-effort
        tb = _round_up(pl.cdiv(B, n_target), 128)
    num_tiles = pl.cdiv(B, tb)
    b_pad = num_tiles * tb

    x_in = x.astype(jnp.float32)
    if b_pad != B:
        # Single small tail pad (f32); no separate dtype-convert pass over x.
        x_in = jnp.pad(x_in, ((0, b_pad - B), (0, 0)))

    # Grid-invariant (VMEM-resident) operands: full block, constant index_map.
    def const_spec(a):
        nd = a.ndim
        return pl.BlockSpec(a.shape, lambda i, _nd=nd: (0,) * _nd)

    n_weight_elems = in_size * h1_size + h1_size * h2_size + h2_size * out_size
    flops = 2 * b_pad * (in_size * h1_size + h1_size * h2_size
                         + h2_size * out_size)
    bytes_accessed = (b_pad * in_size * 4                       # f32 x stream
                      + n_weight_elems * 2                      # bf16 weights (once)
                      + (h1_size + h2_size + out_size) * 4      # f32 biases (once)
                      + b_pad * out_size * 4)                   # f32 output

    out_t = pl.pallas_call(
        mlp_kernel,
        out_shape=jax.ShapeDtypeStruct((out_size, b_pad), jnp.float32),
        grid_spec=pltpu.PrefetchScalarGridSpec(
            num_scalar_prefetch=0,
            grid=(num_tiles,),
            in_specs=[
                pl.BlockSpec((tb, in_size), lambda i: (i, 0)),   # streamed x tile
                const_spec(w1), const_spec(b1),
                const_spec(w2), const_spec(b2),
                const_spec(w3t), const_spec(b3),
            ],
            out_specs=pl.BlockSpec((out_size, tb), lambda i: (0, i)),
        ),
        compiler_params=pltpu.CompilerParams(
            dimension_semantics=("parallel",),   # megacore sharding on v7x
        ),
        cost_estimate=pl.CostEstimate(
            flops=flops, transcendentals=0, bytes_accessed=bytes_accessed),
    )(x_in, w1, b1, w2, b2, w3t, b3)

    # Tiny [out_size, B] -> [B, out_size] transpose in the wrapper.
    return out_t[:, :B].T


def init_params(key, input_size=172, hidden1=10, hidden2=12, output_size=4):
    """Deterministic init mimicking nn.Linear's uniform(-1/sqrt(fan_in), ...)."""
    ks = jax.random.split(key, 6)

    def linear(kw, kb, fan_in, fan_out):
        bound = 1.0 / jnp.sqrt(float(fan_in))
        w = jax.random.uniform(kw, (fan_in, fan_out), jnp.float32, -bound, bound)
        b = jax.random.uniform(kb, (fan_out,), jnp.float32, -bound, bound)
        return w, b

    w1, b1 = linear(ks[0], ks[1], input_size, hidden1)
    w2, b2 = linear(ks[2], ks[3], hidden1, hidden2)
    w3, b3 = linear(ks[4], ks[5], hidden2, output_size)
    return {"w1": w1, "b1": b1, "w2": w2, "b2": b2, "w3": w3, "b3": b3}


def _reference(x, params):
    # Mirrors the kernel's numerics: bf16 x/weights/activations, f32 accumulate.
    def bf(v):
        return v.astype(jnp.bfloat16).astype(jnp.float32)

    h1 = jnp.maximum(bf(x) @ bf(params["w1"]) + params["b1"][None, :], 0.0)
    h2 = jnp.maximum(bf(h1) @ bf(params["w2"]) + params["b2"][None, :], 0.0)
    return bf(h2) @ bf(params["w3"]) + params["b3"][None, :]


if __name__ == "__main__":
    key = jax.random.PRNGKey(0)
    k_p, k1, k2, k3 = jax.random.split(key, 4)

    INPUT, H1, H2, OUT = 172, 10, 12, 4
    params = init_params(k_p, INPUT, H1, H2, OUT)

    cases = (
        ("multi-tile", 512, k1),          # 2 tiles of 256, no padding
        ("single-tile ragged", 13, k2),   # 1 tile of 16, tail pad
        ("multi-tile ragged", 300, k3),   # 2 tiles of 256, tail pad
    )
    for name, B, k in cases:
        x = jax.random.normal(k, (B, INPUT), dtype=jnp.float32)
        out = jax.block_until_ready(network_forward(x, params))
        ref = _reference(x, params)
        assert out.shape == (B, OUT), (name, out.shape)
        assert jnp.allclose(out, ref, atol=5e-3, rtol=5e-3), name

    print("KERNEL_OK")
</pallas_src>

<mosaic_0001>
module attributes {stable_mosaic.version = 11 : i64} {
  func.func @mlp_kernel(%arg0: i32, %arg1: memref<256x172xf32, #tpu.memory_space<vmem>>, %arg2: memref<172x10xbf16, #tpu.memory_space<vmem>>, %arg3: memref<1x10xf32, #tpu.memory_space<vmem>>, %arg4: memref<10x12xbf16, #tpu.memory_space<vmem>>, %arg5: memref<1x12xf32, #tpu.memory_space<vmem>>, %arg6: memref<4x12xbf16, #tpu.memory_space<vmem>>, %arg7: memref<4x1xf32, #tpu.memory_space<vmem>>, %arg8: memref<4x256xf32, #tpu.memory_space<vmem>>) attributes {dimension_semantics = [#tpu.dimension_semantics<parallel>], iteration_bounds = array<i64: 2>, scalar_prefetch = 0 : i64, scratch_operands = 0 : i64, tpu.core_type = #tpu.core_type<tc>, window_params = [{transform_indices = @transform_0, window_bounds = array<i64: 256, 172>}, {pipeline_mode = #tpu.pipeline_mode<synchronous>, transform_indices = @transform_1, window_bounds = array<i64: 172, 10>}, {pipeline_mode = #tpu.pipeline_mode<synchronous>, transform_indices = @transform_2, window_bounds = array<i64: 1, 10>}, {pipeline_mode = #tpu.pipeline_mode<synchronous>, transform_indices = @transform_3, window_bounds = array<i64: 10, 12>}, {pipeline_mode = #tpu.pipeline_mode<synchronous>, transform_indices = @transform_4, window_bounds = array<i64: 1, 12>}, {pipeline_mode = #tpu.pipeline_mode<synchronous>, transform_indices = @transform_5, window_bounds = array<i64: 4, 12>}, {pipeline_mode = #tpu.pipeline_mode<synchronous>, transform_indices = @transform_6, window_bounds = array<i64: 4, 1>}, {transform_indices = @transform_7, window_bounds = array<i64: 4, 256>}]} {
    %c0 = arith.constant 0 : index
    %c0_0 = arith.constant 0 : index
    %0 = vector.load %arg1[%c0, %c0_0] : memref<256x172xf32, #tpu.memory_space<vmem>>, vector<256x172xf32>
    %1 = arith.truncf %0 : vector<256x172xf32> to vector<256x172xbf16>
    %c0_1 = arith.constant 0 : index
    %c0_2 = arith.constant 0 : index
    %2 = vector.load %arg2[%c0_1, %c0_2] : memref<172x10xbf16, #tpu.memory_space<vmem>>, vector<172x10xbf16>
    %cst = arith.constant dense<0.000000e+00> : vector<256x10xf32>
    %3 = tpu.matmul %1, %2, %cst {dimension_numbers = #tpu.dot_dimension_numbers<[1], [0], [0], [1], [0, 0, 1, 1], [], []>} : vector<256x172xbf16>, vector<172x10xbf16>, vector<256x10xf32> -> vector<256x10xf32>
    %c0_3 = arith.constant 0 : index
    %c0_4 = arith.constant 0 : index
    %4 = vector.load %arg3[%c0_3, %c0_4] : memref<1x10xf32, #tpu.memory_space<vmem>>, vector<1x10xf32>
    %5 = vector.broadcast %4 : vector<1x10xf32> to vector<256x10xf32>
    %6 = arith.addf %3, %5 : vector<256x10xf32>
    %cst_5 = arith.constant 0.000000e+00 : f32
    %7 = vector.broadcast %cst_5 : f32 to vector<256x10xf32>
    %8 = arith.maximumf %6, %7 : vector<256x10xf32>
    %9 = arith.truncf %8 : vector<256x10xf32> to vector<256x10xbf16>
    %c0_6 = arith.constant 0 : index
    %c0_7 = arith.constant 0 : index
    %10 = vector.load %arg4[%c0_6, %c0_7] : memref<10x12xbf16, #tpu.memory_space<vmem>>, vector<10x12xbf16>
    %cst_8 = arith.constant dense<0.000000e+00> : vector<256x12xf32>
    %11 = tpu.matmul %9, %10, %cst_8 {dimension_numbers = #tpu.dot_dimension_numbers<[1], [0], [0], [1], [0, 0, 1, 1], [], []>} : vector<256x10xbf16>, vector<10x12xbf16>, vector<256x12xf32> -> vector<256x12xf32>
    %c0_9 = arith.constant 0 : index
    %c0_10 = arith.constant 0 : index
    %12 = vector.load %arg5[%c0_9, %c0_10] : memref<1x12xf32, #tpu.memory_space<vmem>>, vector<1x12xf32>
    %13 = vector.broadcast %12 : vector<1x12xf32> to vector<256x12xf32>
    %14 = arith.addf %11, %13 : vector<256x12xf32>
    %cst_11 = arith.constant 0.000000e+00 : f32
    %15 = vector.broadcast %cst_11 : f32 to vector<256x12xf32>
    %16 = arith.maximumf %14, %15 : vector<256x12xf32>
    %17 = arith.truncf %16 : vector<256x12xf32> to vector<256x12xbf16>
    %c0_12 = arith.constant 0 : index
    %c0_13 = arith.constant 0 : index
    %18 = vector.load %arg6[%c0_12, %c0_13] : memref<4x12xbf16, #tpu.memory_space<vmem>>, vector<4x12xbf16>
    %cst_14 = arith.constant dense<0.000000e+00> : vector<4x256xf32>
    %19 = tpu.matmul %18, %17, %cst_14 {dimension_numbers = #tpu.dot_dimension_numbers<[1], [1], [0], [0], [0, 0, 1, 0], [], []>} : vector<4x12xbf16>, vector<256x12xbf16>, vector<4x256xf32> -> vector<4x256xf32>
    %c0_15 = arith.constant 0 : index
    %c0_16 = arith.constant 0 : index
    %20 = vector.load %arg7[%c0_15, %c0_16] : memref<4x1xf32, #tpu.memory_space<vmem>>, vector<4x1xf32>
    %21 = vector.broadcast %20 : vector<4x1xf32> to vector<4x256xf32>
    %22 = arith.addf %19, %21 : vector<4x256xf32>
    %c0_17 = arith.constant 0 : index
    %c0_18 = arith.constant 0 : index
    %23 = vector.load %arg8[%c0_17, %c0_18] : memref<4x256xf32, #tpu.memory_space<vmem>>, vector<4x256xf32>
    tpu.vector_store %arg8[%c0_17, %c0_18], %22 {strides = array<i32>} : memref<4x256xf32, #tpu.memory_space<vmem>>, vector<4x256xf32>,
    return
  }
  func.func @transform_0(%arg0: i32) -> (i32, i32) {
    %c0_i32 = arith.constant 0 : i32
    %c0_i32_0 = arith.constant 0 : i32
    return %arg0, %c0_i32 : i32, i32
  }
  func.func @transform_1(%arg0: i32) -> (i32, i32) {
    %c0_i32 = arith.constant 0 : i32
    %c0_i32_0 = arith.constant 0 : i32
    %c0_i32_1 = arith.constant 0 : i32
    return %c0_i32, %c0_i32_0 : i32, i32
  }
  func.func @transform_2(%arg0: i32) -> (i32, i32) {
    %c0_i32 = arith.constant 0 : i32
    %c0_i32_0 = arith.constant 0 : i32
    %c0_i32_1 = arith.constant 0 : i32
    return %c0_i32, %c0_i32_0 : i32, i32
  }
  func.func @transform_3(%arg0: i32) -> (i32, i32) {
    %c0_i32 = arith.constant 0 : i32
    %c0_i32_0 = arith.constant 0 : i32
    %c0_i32_1 = arith.constant 0 : i32
    return %c0_i32, %c0_i32_0 : i32, i32
  }
  func.func @transform_4(%arg0: i32) -> (i32, i32) {
    %c0_i32 = arith.constant 0 : i32
    %c0_i32_0 = arith.constant 0 : i32
    %c0_i32_1 = arith.constant 0 : i32
    return %c0_i32, %c0_i32_0 : i32, i32
  }
  func.func @transform_5(%arg0: i32) -> (i32, i32) {
    %c0_i32 = arith.constant 0 : i32
    %c0_i32_0 = arith.constant 0 : i32
    %c0_i32_1 = arith.constant 0 : i32
    return %c0_i32, %c0_i32_0 : i32, i32
  }
  func.func @transform_6(%arg0: i32) -> (i32, i32) {
    %c0_i32 = arith.constant 0 : i32
    %c0_i32_0 = arith.constant 0 : i32
    %c0_i32_1 = arith.constant 0 : i32
    return %c0_i32, %c0_i32_0 : i32, i32
  }
  func.func @transform_7(%arg0: i32) -> (i32, i32) {
    %c0_i32 = arith.constant 0 : i32
    %c0_i32_0 = arith.constant 0 : i32
    return %c0_i32, %arg0 : i32, i32
  }
}

</mosaic_0001>

<bundles_post_ra>
// kernel: tpu_custom_call.1
= control target key start
LH: loop header
LB: loop body
LE: loop exit
PB: predicated region body
PF: predicated region fallthrough
CT: control target
= control target key end

     0   :  { %12 = vsyncpa [#allocation3], 0  ;;  %s1716_s0 = inlined_call_operand.vmem [shape: f32[512,172], index: 0, kind: input, shape index: {}]   ;;  %s1717_s1 = inlined_call_operand.vmem [shape: bf16[172,10], index: 1, kind: input, shape index: {}]   ;;  %s1718_s2 = inlined_call_operand.vmem [shape: f32[1,10], index: 2, kind: input, shape index: {}]   ;;  %s1719_s3 = inlined_call_operand.vmem [shape: bf16[10,12], index: 3, kind: input, shape index: {}]   ;;  %s1720_s4 = inlined_call_operand.vmem [shape: f32[1,12], index: 4, kind: input, shape index: {}]   ;;  %s1721_s5 = inlined_call_operand.vmem [shape: bf16[4,12], index: 5, kind: input, shape index: {}]   ;;  %s1722_s6 = inlined_call_operand.vmem [shape: f32[4,1], index: 6, kind: input, shape index: {}]   ;;  %s1723_s7 = inlined_call_operand.hbm [shape: f32[4,512], index: 7, kind: output, shape index: {}]  }
   0x1   :  { %14 = vsyncpa [#allocation3 + $0x1], 0  ;;  %s1376_s24 = smov 0   ;;  %s1378_s25 = smov 0  }
   0x2   :  { %s1380_s26 = smov 0   ;;  %s1382_s27 = smov 0  }
   0x3 LB: > { %s1397_s28 = sadd.s32 4294967295, %s1333_s27   ;;  %s1119_s29 = sadd.s32 4294967294, %s1333_s27   ;;  %s1333_s27 = sphi %s1382_s27, %s1729_s27   ;;  %s1329_s26 = sphi %s1380_s26, %s1728_s26   ;;  %s1325_s25 = sphi %s1378_s25, %s1727_s25   ;;  %s1321_s24 = sphi %s1376_s24, %s1726_s24  }
   0x4   : > { %s1401_s30 = sadd.s32 1, %s1333_s27   ;;  %s179_s8 = sadd.s32 1, %s1329_s26 }
   0x5   : > { %s176_s9 = ssub.s32 %s1333_s27, %s1401_s30  ;;  %p189_p0 = scmp.ne.s32.totalorder %s1329_s26, %s1325_s25 }
   0x6   : > { %p177_p1 = scmp.eq.s32.totalorder %s176_s9, 0  ;;  %p190_p2 = scmp.eq.s32.totalorder %s1397_s28, 1 }
   0x7   : > { %p195_p3 = scmp.ne.s32.totalorder %s1325_s25, %s1321_s24  ;;  %p196_p4 = scmp.eq.s32.totalorder %s1119_s29, 1 }
   0x8   : > { %s1412_s10 = scalar_select %p177_p1, %s1329_s26, %s179_s8  }
   0x9   : > { %p1414_p5 = por %p190_p2, %p189_p0  ;;  %p1418_p6 = por %p196_p4, %p195_p3 }
   0xa   : > { %p1122_p7 = scmp.ge.s32.totalorder %s1333_s27, 1  ;;  %p242_p8 = scmp.lt.s32.totalorder %s1333_s27, 3 }
   0xc   : > { %p243_p9 = pnand %p1122_p7, %p242_p8 }
   0xd   : > { %s1124_s15 = sshll.u32 (!%p243_p9), %s1397_s28, 5  ;;  %s272_s9 = sand.u32 (!%p243_p9), 1, %s1325_s25  }
   0xe   : > { %246 = sbr.rel (%p243_p9) target bundleno = 783 (0x30f), region = 48  ;;  %p276_p10 = scmp.lt.s32.totalorder (!%p243_p9), %s1124_s15, 63 }
   0xf   : > { %s1123_s13 = sshll.u32 (!%p243_p9), %s272_s9, 3  ;;  %s1227_s14 = sshll.u32 (!%p243_p9), %s1397_s28, 3 }
  0x10   : > { %s274_s19 = scalar_lea.vmem (!%p243_p9), [#allocation2], %s1123_s13  ;;  %s1044_s21 = scalar_lea.sflag (!%p243_p9), [#allocation3], %s272_s9 }
  0x11   : > { %s1057_s20 = sshll.u32 (!%p243_p9), %s274_s19, 4  ;;  %s1291_s8 = scalar_lea.hbm (!%p243_p9), %s1723_s7, 16  ;;  %s1058_s20 = int_to_ptr.vmem [resolvable:$true] %s1057_s20 }
  0x13   : > { %v1222_v0 = vld [vmem:[%s1717_s1 + $0x38] sm:$0xff]  ;;  %v1169_v1 = vld [vmem:[%s1717_s1 + $0x50] sm:$0xf]  ;;  %v1225_v2 = vld [vmem:[%s1717_s1 + $0x50] sm:$0x30]  ;;  %vm520_vm0 = vcmask 1045504  }
  0x14   : > { %524 = vmatpush.bf16.msra.mxu0 %v1222_v0  ;;  %v1221_v3 = vld [vmem:[%s1717_s1 + $0x30] sm:$0xff]  ;;  %v1170_v4 = vor.u32 %v1225_v2, %v1169_v1  ;;  %s1731_s15 = smov (!%p276_p10, %s1124_s15), 63  ;;  %v1224_v6 = vld [vmem:[%s1717_s1 + $0x48] sm:$0xff]  ;;  %v1223_v8 = vld [vmem:[%s1717_s1 + $0x40] sm:$0xff]  ;;  %vm471_vm1 = vcmask 359424   ;;  %vm810_vm2 = vcmask 1044480  }
  0x15   : > { %s1214_s29 = sshll.u32 %s1731_s15, 4  ;;  %v1220_v7 = vld [vmem:[%s1717_s1 + $0x28] sm:$0xff]  ;;  %v1219_v11 = vld [vmem:[%s1717_s1 + $0x20] sm:$0xff]  ;;  %v1218_v13 = vld [vmem:[%s1717_s1 + $0x18] sm:$0xff]  ;;  %vm761_vm3 = vcmask 80896   ;;  %vm958_vm4 = vcmask 97280   ;;  %s1055_s15 = scalar_lea.hbm %s1723_s7, %s1227_s14 }
  0x16   : > { %v522_v5 = vsel %vm520_vm0, %v1170_v4, 0  ;;  %s1446_s16 = scalar_lea.vmem %s1716_s0, %s1214_s29  ;;  %v1217_v14 = vld [vmem:[%s1717_s1 + $0x10] sm:$0xff]  ;;  %v1216_v15 = vld [vmem:[%s1717_s1 + $0x8] sm:$0xff]  ;;  %v1215_v18 = vld [vmem:[%s1717_s1] sm:$0xff]  ;;  %vm1039_vm5 = vcmask 1043456  }
  0x17   : > { %618 = vmatpush.bf16.msra.mxu1 %v522_v5  ;;  %v285_v9 = vld [vmem:[%s1446_s16 + $0x8] sm:$0xff]  ;;  %v287_v10 = vld [vmem:[%s1446_s16 + $0x18] sm:$0xff]  ;;  %v284_v19 = vld [vmem:[%s1446_s16] sm:$0xff] }
  0x18   : > { %525 = vmatpush.bf16.msra.mxu0 %v1221_v3  ;;  %v349_v12 = vpack.c.bf16 %v287_v10, %v285_v9  ;;  %v289_v16 = vld [vmem:[%s1446_s16 + $0x28] sm:$0xff]  ;;  %v291_v17 = vld [vmem:[%s1446_s16 + $0x38] sm:$0xff]  ;;  %v286_v20 = vld [vmem:[%s1446_s16 + $0x10] sm:$0xff] }
  0x19   : > { %v351_v21 = vpack.c.bf16 %v291_v17, %v289_v16  ;;  %v348_v22 = vpack.c.bf16 %v286_v20, %v284_v19  ;;  %v293_v23 = vld [vmem:[%s1446_s16 + $0x48] sm:$0xff]  ;;  %v295_v24 = vld [vmem:[%s1446_s16 + $0x58] sm:$0xff]  ;;  %v288_v25 = vld [vmem:[%s1446_s16 + $0x20] sm:$0xff] }
  0x1a   : > { %v290_v26 = vld [vmem:[%s1446_s16 + $0x30] sm:$0xff]  ;;  %v353_v27 = vpack.c.bf16 %v295_v24, %v293_v23  ;;  %v297_v29 = vld [vmem:[%s1446_s16 + $0x68] sm:$0xff]  ;;  %v299_v30 = vld [vmem:[%s1446_s16 + $0x78] sm:$0xff] }
  0x1b   : > { %619 = vmatpush.bf16.msra.mxu1 %v1224_v6  ;;  %v350_v28 = vpack.c.bf16 %v290_v26, %v288_v25  ;;  %v292_v31 = vld [vmem:[%s1446_s16 + $0x40] sm:$0xff]  ;;  %v294_v32 = vld [vmem:[%s1446_s16 + $0x50] sm:$0xff]  ;;  %v355_v33 = vpack.c.bf16 %v299_v30, %v297_v29  ;;  %v301_v35 = vld [vmem:[%s1446_s16 + $0x88] sm:$0xff] }
  0x1c   : > { %526 = vmatpush.bf16.msra.mxu0 %v1220_v7  ;;  %v352_v34 = vpack.c.bf16 %v294_v32, %v292_v31  ;;  %v303_v36 = vld [vmem:[%s1446_s16 + $0x98] sm:$0xff]  ;;  %v296_v37 = vld [vmem:[%s1446_s16 + $0x60] sm:$0xff]  ;;  %v298_v38 = vld [vmem:[%s1446_s16 + $0x70] sm:$0xff] }
  0x1d   : > { %v357_v39 = vpack.c.bf16 %v303_v36, %v301_v35  ;;  %v354_v40 = vpack.c.bf16 %v298_v38, %v296_v37  ;;  %v305_v41 = vld [vmem:[%s1446_s16 + $0xa8] sm:$0xff]  ;;  %v307_v42 = vld [vmem:[%s1446_s16 + $0xb8] sm:$0xff]  ;;  %v300_v43 = vld [vmem:[%s1446_s16 + $0x80] sm:$0xff] }
  0x1e   : > { %v302_v44 = vld [vmem:[%s1446_s16 + $0x90] sm:$0xff]  ;;  %v359_v45 = vpack.c.bf16 %v307_v42, %v305_v41  ;;  %v309_v47 = vld [vmem:[%s1446_s16 + $0xc8] sm:$0xff]  ;;  %v311_v48 = vld [vmem:[%s1446_s16 + $0xd8] sm:$0xff] }
  0x1f   : > { %620 = vmatpush.bf16.msra.mxu1 %v1223_v8  ;;  %v356_v46 = vpack.c.bf16 %v302_v44, %v300_v43  ;;  %v304_v49 = vld [vmem:[%s1446_s16 + $0xa0] sm:$0xff]  ;;  %v306_v50 = vld [vmem:[%s1446_s16 + $0xb0] sm:$0xff]  ;;  %v361_v51 = vpack.c.bf16 %v311_v48, %v309_v47  ;;  %v313_v53 = vld [vmem:[%s1446_s16 + $0xe8] sm:$0xff] }
  0x20   : > { %527 = vmatpush.bf16.msra.mxu0 %v1219_v11  ;;  %v358_v52 = vpack.c.bf16 %v306_v50, %v304_v49  ;;  %v315_v54 = vld [vmem:[%s1446_s16 + $0xf8] sm:$0xff]  ;;  %v308_v55 = vld [vmem:[%s1446_s16 + $0xc0] sm:$0xff]  ;;  %v310_v56 = vld [vmem:[%s1446_s16 + $0xd0] sm:$0xff] }
  0x21   : > { %v363_v57 = vpack.c.bf16 %v315_v54, %v313_v53  ;;  %v360_v58 = vpack.c.bf16 %v310_v56, %v308_v55  ;;  %v1189_v59 = vld [vmem:[%s1719_s3] sm:$0xf]  ;;  %v317_v60 = vld [vmem:[%s1446_s16 + $0x108] sm:$0xff]  ;;  %v319_v61 = vld [vmem:[%s1446_s16 + $0x118] sm:$0xff] }
  0x22   : > { %1171 = vmatmul.msk.bf16.vlgmr.msra.gmra.mxu1 %vm471_vm1, %v349_v12  ;;  %v1226_v62 = vld [vmem:[%s1719_s3] sm:$0x10]  ;;  %v314_v0 = vld [vmem:[%s1446_s16 + $0xf0] sm:$0xff]  ;;  %v365_v2 = vpack.c.bf16 %v319_v61, %v317_v60  ;;  %v321_v7 = vld [vmem:[%s1446_s16 + $0x128] sm:$0xff] }
  0x23   : > { %v312_v63 = vld [vmem:[%s1446_s16 + $0xe0] sm:$0xff]  ;;  %v1190_v1 = vor.u32 %v1226_v62, %v1189_v59  ;;  %v323_v8 = vld [vmem:[%s1446_s16 + $0x138] sm:$0xff]  ;;  %v318_v10 = vld [vmem:[%s1446_s16 + $0x110] sm:$0xff] }
  0x24   : > { %528 = vmatpush.bf16.msra.mxu0 %v1218_v13  ;;  %v362_v4 = vpack.c.bf16 %v314_v0, %v312_v63  ;;  %v316_v9 = vld [vmem:[%s1446_s16 + $0x100] sm:$0xff]  ;;  %v367_v11 = vpack.c.bf16 %v323_v8, %v321_v7  ;;  %v327_v23 = vld [vmem:[%s1446_s16 + $0x158] sm:$0xff]  ;;  %v322_v25 = vld [vmem:[%s1446_s16 + $0x130] sm:$0xff] }
  0x25   : > { %v812_v3 = vsel %vm810_vm2, %v1190_v1, 0  ;;  %v364_v12 = vpack.c.bf16 %v318_v10, %v316_v9  ;;  %v320_v24 = vld [vmem:[%s1446_s16 + $0x120] sm:$0xff]  ;;  %v326_v42 = vld [vmem:[%s1446_s16 + $0x150] sm:$0xff]  ;;  %v333_v56 = vld [vmem:[%s1446_s16 + $0x188] sm:$0xff] }
  0x26   : > { %821 = vmatpush.bf16.msra.mxu2 %v812_v3  ;;  %v366_v30 = vpack.c.bf16 %v322_v25, %v320_v24  ;;  %v324_v41 = vld [vmem:[%s1446_s16 + $0x140] sm:$0xff]  ;;  %v330_v59 = vld [vmem:[%s1446_s16 + $0x170] sm:$0xff]  ;;  %v337_v9 = vld [vmem:[%s1446_s16 + $0x1a8] sm:$0xff] }
  0x27   : > { %v368_v47 = vpack.c.bf16 %v326_v42, %v324_v41  ;;  %v339_v10 = vld [vmem:[%s1446_s16 + $0x1b8] sm:$0xff] }
  0x28   : > { %529 = vmatpush.bf16.msra.mxu0 %v1217_v14 }
  0x2c   : > { %530 = vmatpush.bf16.msra.mxu0 %v1216_v15  ;;  %v1522_v15 = vld [vmem:[%s1718_s2] ss:$0 sm:$0xff] }
  0x30   : > { %531 = vmatpush.bf16.msra.mxu0 %v1215_v18 }
  0x32   : > { %1172 = vmatmul.msk.bf16.gmra.mxu1 %vm471_vm1, %v351_v21 }
  0x33   : > { %532 = vmatmul.bf16.vlgmr.msra.gmra.mxu0 %v348_v22  ;;  %v325_v22 = vld [vmem:[%s1446_s16 + $0x148] sm:$0xff] }
  0x42   : > { %1173 = vmatmul.msk.bf16.gmra.mxu1 %vm471_vm1, %v353_v27 }
  0x43   : > { %537 = vmatmul.bf16.gmra.mxu0 %v350_v28  ;;  %v369_v28 = vpack.c.bf16 %v327_v23, %v325_v22 }
  0x52   : > { %1174 = vmatmul.msk.bf16.gmra.mxu1 %vm471_vm1, %v355_v33 }
  0x53   : > { %542 = vmatmul.bf16.gmra.mxu0 %v352_v34 }
  0x62   : > { %1175 = vmatmul.msk.bf16.gmra.mxu1 %vm471_vm1, %v357_v39  ;;  %v329_v39 = vld [vmem:[%s1446_s16 + $0x168] sm:$0xff] }
  0x63   : > { %547 = vmatmul.bf16.gmra.mxu0 %v354_v40  ;;  %v331_v40 = vld [vmem:[%s1446_s16 + $0x178] sm:$0xff] }
  0x72   : > { %1176 = vmatmul.msk.bf16.gmra.mxu1 %vm471_vm1, %v359_v45  ;;  %v371_v45 = vpack.c.bf16 %v331_v40, %v329_v39 }
  0x73   : > { %552 = vmatmul.bf16.gmra.mxu0 %v356_v46 }
  0x82   : > { %1177 = vmatmul.msk.bf16.gmra.mxu1 %vm471_vm1, %v361_v51 }
  0x83   : > { %557 = vmatmul.bf16.gmra.mxu0 %v358_v52 }
  0x92   : > { %1178 = vmatmul.msk.bf16.gmra.mxu1 %vm471_vm1, %v363_v57  ;;  %v335_v57 = vld [vmem:[%s1446_s16 + $0x198] sm:$0xff] }
  0x93   : > { %562 = vmatmul.bf16.gmra.mxu0 %v360_v58  ;;  %v328_v58 = vld [vmem:[%s1446_s16 + $0x160] sm:$0xff]  ;;  %v373_v62 = vpack.c.bf16 %v335_v57, %v333_v56 }
  0x94   : > { %v370_v0 = vpack.c.bf16 %v330_v59, %v328_v58 }
  0x9f   : > { %v622_v5 = vpop.f32.mrf.mxu1 }
  0xa2   : > { %1179 = vmatmul.msk.bf16.gmra.mxu1 %vm471_vm1, %v365_v2 }
  0xa3   : > { %567 = vmatmul.bf16.gmra.mxu0 %v362_v4 }
  0xa7   : > { %v624_v6 = vpop.f32.mrf.mxu1 }
  0xaf   : > { %v627_v13 = vpop.f32.mrf.mxu1 }
  0xb0   : > { %v533_v14 = vpop.f32.mrf.mxu0 }
  0xb1   : > { %v534_v16 = vadd.f32 %v1522_v15, %v533_v14 }
  0xb2   : > { %1180 = vmatmul.msk.bf16.gmra.mxu1 %vm471_vm1, %v367_v11  ;;  %v332_v11 = vld [vmem:[%s1446_s16 + $0x180] sm:$0xff] }
  0xb3   : > { %572 = vmatmul.bf16.gmra.mxu0 %v364_v12  ;;  %v623_v19 = vadd.f32 %v622_v5, %v534_v16  ;;  %v334_v12 = vld [vmem:[%s1446_s16 + $0x190] sm:$0xff]  ;;  %v375_v16 = vpack.c.bf16 %v339_v10, %v337_v9 }
  0xb5   : > { %v702_v26 = vmax.f32 %v623_v19, 0.0 }
  0xb7   : > { %v629_v17 = vpop.f32.mrf.mxu1 }
  0xb8   : > { %v535_v18 = vpop.f32.mrf.mxu0 }
  0xb9   : > { %v536_v20 = vadd.f32 %v1522_v15, %v535_v18  ;;  %v372_v18 = vpack.c.bf16 %v334_v12, %v332_v11 }
  0xbb   : > { %v625_v21 = vadd.f32 %v624_v6, %v536_v20 }
  0xbd   : > { %v703_v27 = vmax.f32 %v625_v21, 0.0 }
  0xbf   : > { %v734_v29 = vpack.c.bf16 %v703_v27, %v702_v26  ;;  %v632_v31 = vpop.f32.mrf.mxu1  ;;  %v341_v27 = vld [vmem:[%s1446_s16 + $0x1c8] sm:$0xff] }
  0xc0   : > { %v538_v32 = vpop.f32.mrf.mxu0 }
  0xc1   : > { %1191 = vmatmul.msk.bf16.vlgmr.msra.gmra.mxu2 %vm761_vm3, %v734_v29  ;;  %v539_v33 = vadd.f32 %v1522_v15, %v538_v32  ;;  %v336_v29 = vld [vmem:[%s1446_s16 + $0x1a0] sm:$0xff] }
  0xc2   : > { %1181 = vmatmul.msk.bf16.gmra.mxu1 %vm471_vm1, %v369_v28  ;;  %v343_v28 = vld [vmem:[%s1446_s16 + $0x1d8] sm:$0xff] }
  0xc3   : > { %577 = vmatmul.bf16.gmra.mxu0 %v366_v30  ;;  %v628_v36 = vadd.f32 %v627_v13, %v539_v33  ;;  %v338_v30 = vld [vmem:[%s1446_s16 + $0x1b0] sm:$0xff]  ;;  %v377_v33 = vpack.c.bf16 %v343_v28, %v341_v27 }
  0xc5   : > { %v704_v43 = vmax.f32 %v628_v36, 0.0 }
  0xc7   : > { %v634_v34 = vpop.f32.mrf.mxu1 }
  0xc8   : > { %v540_v35 = vpop.f32.mrf.mxu0 }
  0xc9   : > { %v541_v37 = vadd.f32 %v1522_v15, %v540_v35  ;;  %v374_v35 = vpack.c.bf16 %v338_v30, %v336_v29  ;;  %v1588_v30 = vld [vmem:[%s1720_s4] ss:$0 sm:$0xff] }
  0xcb   : > { %v630_v38 = vadd.f32 %v629_v17, %v541_v37 }
  0xcd   : > { %v705_v44 = vmax.f32 %v630_v38, 0.0 }
  0xcf   : > { %v735_v46 = vpack.c.bf16 %v705_v44, %v704_v43  ;;  %v637_v48 = vpop.f32.mrf.mxu1  ;;  %v345_v44 = vld [vmem:[%s1446_s16 + $0x1e8] sm:$0xff] }
  0xd0   : > { %v543_v49 = vpop.f32.mrf.mxu0 }
  0xd1   : > { %1192 = vmatmul.msk.bf16.gmra.mxu2 %vm761_vm3, %v735_v46  ;;  %v544_v50 = vadd.f32 %v1522_v15, %v543_v49  ;;  %v340_v46 = vld [vmem:[%s1446_s16 + $0x1c0] sm:$0xff] }
  0xd2   : > { %1182 = vmatmul.msk.bf16.gmra.mxu1 %vm471_vm1, %v371_v45  ;;  %v347_v45 = vld [vmem:[%s1446_s16 + $0x1f8] sm:$0xff] }
  0xd3   : > { %582 = vmatmul.bf16.gmra.mxu0 %v368_v47  ;;  %v633_v53 = vadd.f32 %v632_v31, %v544_v50  ;;  %v342_v47 = vld [vmem:[%s1446_s16 + $0x1d0] sm:$0xff]  ;;  %v379_v50 = vpack.c.bf16 %v347_v45, %v345_v44 }
  0xd5   : > { %v706_v60 = vmax.f32 %v633_v53, 0.0 }
  0xd7   : > { %v639_v51 = vpop.f32.mrf.mxu1 }
  0xd8   : > { %v545_v52 = vpop.f32.mrf.mxu0 }
  0xd9   : > { %v546_v54 = vadd.f32 %v1522_v15, %v545_v52  ;;  %v376_v52 = vpack.c.bf16 %v342_v47, %v340_v46 }
  0xdb   : > { %v635_v55 = vadd.f32 %v634_v34, %v546_v54 }
  0xdd   : > { %v707_v61 = vmax.f32 %v635_v55, 0.0 }
  0xdf   : > { %v736_v63 = vpack.c.bf16 %v707_v61, %v706_v60  ;;  %v642_v1 = vpop.f32.mrf.mxu1  ;;  %v344_v61 = vld [vmem:[%s1446_s16 + $0x1e0] sm:$0xff] }
  0xe0   : > { %v548_v2 = vpop.f32.mrf.mxu0 }
  0xe1   : > { %1193 = vmatmul.msk.bf16.gmra.mxu2 %vm761_vm3, %v736_v63  ;;  %v549_v3 = vadd.f32 %v1522_v15, %v548_v2 }
  0xe2   : > { %1183 = vmatmul.msk.bf16.gmra.mxu1 %vm471_vm1, %v373_v62  ;;  %v346_v62 = vld [vmem:[%s1446_s16 + $0x1f0] sm:$0xff]  ;;  %s1059_s16 = sshll.u32 %s1055_s15, 4  ;;  %s1060_s16 = int_to_ptr.hbm [resolvable:$true] %s1059_s16 }
  0xe3   : > { %587 = vmatmul.bf16.gmra.mxu0 %v370_v0  ;;  %v638_v6 = vadd.f32 %v637_v48, %v549_v3  ;;  %v378_v2 = vpack.c.bf16 %v346_v62, %v344_v61  ;;  %s1285_s28 = sshra.s32 %s1060_s16, 4  ;;  %s1286_s28 = int_to_ptr.hbm [resolvable:$true] %s1285_s28 }
  0xe4   : > { %s1287_s22 = scalar_lea.hbm %s1286_s28, 8  ;;  %p1292_p0 = scmp.lt.s32.totalorder %s1286_s28, %s1723_s7 }
  0xe5   : > { %v708_v13 = vmax.f32 %v638_v6, 0.0  ;;  %p1288_p11 = scmp.ne.s32.totalorder %s1286_s28, %s1287_s22  ;;  %p1293_p1 = scmp.lt.s32.totalorder %s1291_s8, %s1287_s22 }
  0xe7   : > { %v644_v4 = vpop.f32.mrf.mxu1  ;;  %p1289_p12 = pnand %p1288_p11, %p1414_p5  ;;  %p1294_p2 = por %p1293_p1, %p1292_p0 }
  0xe8   : > { %v550_v5 = vpop.f32.mrf.mxu0 }
  0xe9   : > { %v551_v7 = vadd.f32 %v1522_v15, %v550_v5  ;;  %p1290_p13 = pneg %p1289_p12 }
  0xeb   : > { %v640_v8 = vadd.f32 %v639_v51, %v551_v7  ;;  %p1295_p3 = pnand %p1294_p2, %p1290_p13 }
  0xed   : > { %v709_v14 = vmax.f32 %v640_v8, 0.0 }
  0xef   : > { %v737_v17 = vpack.c.bf16 %v709_v14, %v708_v13  ;;  %v647_v19 = vpop.f32.mrf.mxu1 }
  0xf0   : > { %v553_v20 = vpop.f32.mrf.mxu0 }
  0xf1   : > { %1194 = vmatmul.msk.bf16.gmra.mxu2 %vm761_vm3, %v737_v17  ;;  %v554_v21 = vadd.f32 %v1522_v15, %v553_v20 }
  0xf2   : > { %1184 = vmatmul.msk.bf16.gmra.mxu1 %vm471_vm1, %v375_v16 }
  0xf3   : > { %592 = vmatmul.bf16.gmra.mxu0 %v372_v18  ;;  %v643_v24 = vadd.f32 %v642_v1, %v554_v21 }
  0xf5   : > { %v710_v31 = vmax.f32 %v643_v24, 0.0 }
  0xf7   : > { %v649_v22 = vpop.f32.mrf.mxu1 }
  0xf8   : > { %v555_v23 = vpop.f32.mrf.mxu0 }
  0xf9   : > { %v556_v25 = vadd.f32 %v1522_v15, %v555_v23 }
  0xfb   : > { %v645_v26 = vadd.f32 %v644_v4, %v556_v25 }
  0xfd   : > { %v711_v32 = vmax.f32 %v645_v26, 0.0 }
  0xff   : > { %v738_v34 = vpack.c.bf16 %v711_v32, %v710_v31  ;;  %v652_v36 = vpop.f32.mrf.mxu1 }
 0x100   : > { %v558_v37 = vpop.f32.mrf.mxu0 }
 0x101   : > { %1195 = vmatmul.msk.bf16.gmra.mxu2 %vm761_vm3, %v738_v34  ;;  %v559_v38 = vadd.f32 %v1522_v15, %v558_v37 }
 0x102   : > { %1185 = vmatmul.msk.bf16.gmra.mxu1 %vm471_vm1, %v377_v33 }
 0x103   : > { %597 = vmatmul.bf16.gmra.mxu0 %v374_v35  ;;  %v648_v41 = vadd.f32 %v647_v19, %v559_v38 }
 0x105   : > { %v712_v48 = vmax.f32 %v648_v41, 0.0 }
 0x107   : > { %v654_v39 = vpop.f32.mrf.mxu1 }
 0x108   : > { %v560_v40 = vpop.f32.mrf.mxu0 }
 0x109   : > { %v561_v42 = vadd.f32 %v1522_v15, %v560_v40 }
 0x10b   : > { %v650_v43 = vadd.f32 %v649_v22, %v561_v42 }
 0x10d   : > { %v713_v49 = vmax.f32 %v650_v43, 0.0 }
 0x10f   : > { %v739_v51 = vpack.c.bf16 %v713_v49, %v712_v48  ;;  %v657_v53 = vpop.f32.mrf.mxu1 }
 0x110   : > { %v563_v54 = vpop.f32.mrf.mxu0 }
 0x111   : > { %1196 = vmatmul.msk.bf16.gmra.mxu2 %vm761_vm3, %v739_v51  ;;  %v564_v55 = vadd.f32 %v1522_v15, %v563_v54 }
 0x112   : > { %1186 = vmatmul.msk.bf16.gmra.mxu1 %vm471_vm1, %v379_v50 }
 0x113   : > { %602 = vmatmul.bf16.gmra.mxu0 %v376_v52  ;;  %v653_v58 = vadd.f32 %v652_v36, %v564_v55 }
 0x115   : > { %v714_v63 = vmax.f32 %v653_v58, 0.0 }
 0x117   : > { %v659_v56 = vpop.f32.mrf.mxu1 }
 0x118   : > { %v565_v57 = vpop.f32.mrf.mxu0 }
 0x119   : > { %v566_v59 = vadd.f32 %v1522_v15, %v565_v57 }
 0x11b   : > { %v655_v60 = vadd.f32 %v654_v39, %v566_v59 }
 0x11d   : > { %v715_v0 = vmax.f32 %v655_v60, 0.0 }
 0x11f   : > { %v740_v1 = vpack.c.bf16 %v715_v0, %v714_v63  ;;  %v662_v3 = vpop.f32.mrf.mxu1 }
 0x120   : > { %v568_v4 = vpop.f32.mrf.mxu0 }
 0x121   : > { %1197 = vmatmul.msk.bf16.gmra.mxu2 %vm761_vm3, %v740_v1  ;;  %v569_v5 = vadd.f32 %v1522_v15, %v568_v4 }
 0x123   : > { %607 = vmatmul.bf16.gmra.mxu0 %v378_v2  ;;  %v658_v8 = vadd.f32 %v657_v53, %v569_v5 }
 0x125   : > { %v716_v11 = vmax.f32 %v658_v8, 0.0 }
 0x127   : > { %v664_v6 = vpop.f32.mrf.mxu1 }
 0x128   : > { %v570_v7 = vpop.f32.mrf.mxu0 }
 0x129   : > { %v571_v9 = vadd.f32 %v1522_v15, %v570_v7 }
 0x12b   : > { %v660_v10 = vadd.f32 %v659_v56, %v571_v9 }
 0x12d   : > { %v717_v12 = vmax.f32 %v660_v10, 0.0 }
 0x12f   : > { %v741_v13 = vpack.c.bf16 %v717_v12, %v716_v11  ;;  %v667_v14 = vpop.f32.mrf.mxu1 }
 0x130   : > { %v573_v16 = vpop.f32.mrf.mxu0 }
 0x131   : > { %1198 = vmatmul.msk.bf16.gmra.mxu2 %vm761_vm3, %v741_v13  ;;  %v574_v17 = vadd.f32 %v1522_v15, %v573_v16 }
 0x133   : > { %v663_v20 = vadd.f32 %v662_v3, %v574_v17 }
 0x135   : > { %v718_v23 = vmax.f32 %v663_v20, 0.0 }
 0x137   : > { %v669_v18 = vpop.f32.mrf.mxu1 }
 0x138   : > { %v575_v19 = vpop.f32.mrf.mxu0 }
 0x139   : > { %v576_v21 = vadd.f32 %v1522_v15, %v575_v19 }
 0x13b   : > { %v665_v22 = vadd.f32 %v664_v6, %v576_v21 }
 0x13d   : > { %v719_v24 = vmax.f32 %v665_v22, 0.0 }
 0x13f   : > { %v742_v25 = vpack.c.bf16 %v719_v24, %v718_v23  ;;  %v672_v26 = vpop.f32.mrf.mxu1 }
 0x140   : > { %v578_v27 = vpop.f32.mrf.mxu0 }
 0x141   : > { %1199 = vmatmul.msk.bf16.gmra.mxu2 %vm761_vm3, %v742_v25  ;;  %v579_v29 = vadd.f32 %v1522_v15, %v578_v27 }
 0x143   : > { %v668_v33 = vadd.f32 %v667_v14, %v579_v29 }
 0x144   : > { %v823_v28 = vpop.f32.mrf.mxu2 }
 0x145   : > { %v824_v35 = vadd.f32 %v1588_v30, %v823_v28  ;;  %v720_v38 = vmax.f32 %v668_v33, 0.0 }
 0x147   : > { %v674_v31 = vpop.f32.mrf.mxu1  ;;  %v903_v41 = vmax.f32 %v824_v35, 0.0 }
 0x148   : > { %v580_v32 = vpop.f32.mrf.mxu0 }
 0x149   : > { %v581_v34 = vadd.f32 %v1522_v15, %v580_v32 }
 0x14b   : > { %v670_v36 = vadd.f32 %v669_v18, %v581_v34 }
 0x14c   : > { %v825_v37 = vpop.f32.mrf.mxu2 }
 0x14d   : > { %v721_v39 = vmax.f32 %v670_v36, 0.0  ;;  %v826_v40 = vadd.f32 %v1588_v30, %v825_v37 }
 0x14f   : > { %v904_v42 = vmax.f32 %v826_v40, 0.0  ;;  %v743_v43 = vpack.c.bf16 %v721_v39, %v720_v38  ;;  %v677_v45 = vpop.f32.mrf.mxu1 }
 0x150   : > { %v583_v44 = vpop.f32.mrf.mxu0 }
 0x151   : > { %1200 = vmatmul.msk.bf16.gmra.mxu2 %vm761_vm3, %v743_v43  ;;  %v1594_v46 = vpack.c.bf16 %v904_v42, %v903_v41  ;;  %v584_v48 = vadd.f32 %v1522_v15, %v583_v44 }
 0x153   : > { %v673_v50 = vadd.f32 %v672_v26, %v584_v48 }
 0x154   : > { %v828_v47 = vpop.f32.mrf.mxu2 }
 0x155   : > { %v829_v53 = vadd.f32 %v1588_v30, %v828_v47  ;;  %v722_v56 = vmax.f32 %v673_v50, 0.0 }
 0x157   : > { %v679_v52 = vpop.f32.mrf.mxu1  ;;  %v905_v59 = vmax.f32 %v829_v53, 0.0 }
 0x158   : > { %v585_v49 = vpop.f32.mrf.mxu0 }
 0x159   : > { %v586_v51 = vadd.f32 %v1522_v15, %v585_v49 }
 0x15b   : > { %v675_v54 = vadd.f32 %v674_v31, %v586_v51 }
 0x15c   : > { %v830_v55 = vpop.f32.mrf.mxu2 }
 0x15d   : > { %v723_v57 = vmax.f32 %v675_v54, 0.0  ;;  %v831_v58 = vadd.f32 %v1588_v30, %v830_v55 }
 0x15f   : > { %v906_v60 = vmax.f32 %v831_v58, 0.0  ;;  %v744_v61 = vpack.c.bf16 %v723_v57, %v722_v56  ;;  %v682_v1 = vpop.f32.mrf.mxu1 }
 0x160   : > { %v588_v62 = vpop.f32.mrf.mxu0 }
 0x161   : > { %1201 = vmatmul.msk.bf16.gmra.mxu2 %vm761_vm3, %v744_v61  ;;  %v1601_v63 = vpack.c.bf16 %v906_v60, %v905_v59  ;;  %v589_v2 = vadd.f32 %v1522_v15, %v588_v62 }
 0x163   : > { %v678_v4 = vadd.f32 %v677_v45, %v589_v2 }
 0x164   : > { %v833_v0 = vpop.f32.mrf.mxu2 }
 0x165   : > { %v834_v6 = vadd.f32 %v1588_v30, %v833_v0  ;;  %v724_v9 = vmax.f32 %v678_v4, 0.0 }
 0x167   : > { %v684_v12 = vpop.f32.mrf.mxu1  ;;  %v907_v13 = vmax.f32 %v834_v6, 0.0 }
 0x168   : > { %v590_v3 = vpop.f32.mrf.mxu0 }
 0x169   : > { %v591_v5 = vadd.f32 %v1522_v15, %v590_v3 }
 0x16b   : > { %v680_v7 = vadd.f32 %v679_v52, %v591_v5 }
 0x16c   : > { %v835_v8 = vpop.f32.mrf.mxu2 }
 0x16d   : > { %v725_v10 = vmax.f32 %v680_v7, 0.0  ;;  %v836_v11 = vadd.f32 %v1588_v30, %v835_v8 }
 0x16f   : > { %v908_v14 = vmax.f32 %v836_v11, 0.0  ;;  %v745_v16 = vpack.c.bf16 %v725_v10, %v724_v9  ;;  %v687_v22 = vpop.f32.mrf.mxu1 }
 0x170   : > { %v593_v17 = vpop.f32.mrf.mxu0 }
 0x171   : > { %1202 = vmatmul.msk.bf16.gmra.mxu2 %vm761_vm3, %v745_v16  ;;  %v1608_v18 = vpack.c.bf16 %v908_v14, %v907_v13  ;;  %v594_v20 = vadd.f32 %v1522_v15, %v593_v17 }
 0x173   : > { %v683_v23 = vadd.f32 %v682_v1, %v594_v20 }
 0x174   : > { %v838_v19 = vpop.f32.mrf.mxu2 }
 0x175   : > { %v839_v25 = vadd.f32 %v1588_v30, %v838_v19  ;;  %v726_v28 = vmax.f32 %v683_v23, 0.0 }
 0x177   : > { %v909_v32 = vmax.f32 %v839_v25, 0.0  ;;  %v689_v37 = vpop.f32.mrf.mxu1 }
 0x178   : > { %v595_v21 = vpop.f32.mrf.mxu0 }
 0x179   : > { %v596_v24 = vadd.f32 %v1522_v15, %v595_v21 }
 0x17b   : > { %v685_v26 = vadd.f32 %v684_v12, %v596_v24 }
 0x17c   : > { %v840_v27 = vpop.f32.mrf.mxu2 }
 0x17d   : > { %v727_v29 = vmax.f32 %v685_v26, 0.0  ;;  %v841_v31 = vadd.f32 %v1588_v30, %v840_v27 }
 0x17f   : > { %v746_v33 = vpack.c.bf16 %v727_v29, %v726_v28  ;;  %v910_v34 = vmax.f32 %v841_v31, 0.0  ;;  %v692_v45 = vpop.f32.mrf.mxu1 }
 0x180   : > { %v598_v35 = vpop.f32.mrf.mxu0 }
 0x181   : > { %1203 = vmatmul.msk.bf16.gmra.mxu2 %vm761_vm3, %v746_v33  ;;  %v1615_v36 = vpack.c.bf16 %v910_v34, %v909_v32  ;;  %v599_v39 = vadd.f32 %v1522_v15, %v598_v35 }
 0x183   : > { %v688_v41 = vadd.f32 %v687_v22, %v599_v39 }
 0x184   : > { %v843_v38 = vpop.f32.mrf.mxu2 }
 0x185   : > { %v844_v43 = vadd.f32 %v1588_v30, %v843_v38  ;;  %v728_v48 = vmax.f32 %v688_v41, 0.0 }
 0x187   : > { %v911_v51 = vmax.f32 %v844_v43, 0.0  ;;  %v694_v58 = vpop.f32.mrf.mxu1 }
 0x188   : > { %v600_v40 = vpop.f32.mrf.mxu0 }
 0x189   : > { %v601_v42 = vadd.f32 %v1522_v15, %v600_v40 }
 0x18b   : > { %v690_v44 = vadd.f32 %v689_v37, %v601_v42 }
 0x18c   : > { %v845_v47 = vpop.f32.mrf.mxu2 }
 0x18d   : > { %v729_v49 = vmax.f32 %v690_v44, 0.0  ;;  %v846_v50 = vadd.f32 %v1588_v30, %v845_v47 }
 0x18f   : > { %v747_v52 = vpack.c.bf16 %v729_v49, %v728_v48  ;;  %v912_v53 = vmax.f32 %v846_v50, 0.0  ;;  %v697_v4 = vpop.f32.mrf.mxu1 }
 0x190   : > { %v603_v54 = vpop.f32.mrf.mxu0 }
 0x191   : > { %1204 = vmatmul.msk.bf16.gmra.mxu2 %vm761_vm3, %v747_v52  ;;  %v939_v55 = vpack.c.bf16 %v912_v53, %v911_v51  ;;  %v604_v57 = vadd.f32 %v1522_v15, %v603_v54 }
 0x193   : > { %v693_v60 = vadd.f32 %v692_v45, %v604_v57  ;;  %v975_v50 = vsel %vm958_vm4, %v939_v55, 0  ;;  %v972_v57 = vsel %vm958_vm4, %v1615_v36, 0 }
 0x194   : > { %v848_v56 = vpop.f32.mrf.mxu2 }
 0x195   : > { %v730_v1 = vmax.f32 %v693_v60, 0.0  ;;  %v849_v34 = vadd.f32 %v1588_v30, %v848_v56  ;;  %v969_v60 = vsel %vm958_vm4, %v1608_v18, 0 }
 0x197   : > { %v699_v11 = vpop.f32.mrf.mxu1  ;;  %v913_v40 = vmax.f32 %v849_v34, 0.0 }
 0x198   : > { %v605_v59 = vpop.f32.mrf.mxu0 }
 0x199   : > { %v606_v61 = vadd.f32 %v1522_v15, %v605_v59 }
 0x19b   : > { %v695_v62 = vadd.f32 %v694_v58, %v606_v61 }
 0x19c   : > { %v850_v0 = vpop.f32.mrf.mxu2 }
 0x19d   : > { %v731_v2 = vmax.f32 %v695_v62, 0.0  ;;  %v851_v32 = vadd.f32 %v1588_v30, %v850_v0 }
 0x19f   : > { %v748_v3 = vpack.c.bf16 %v731_v2, %v730_v1  ;;  %v914_v35 = vmax.f32 %v851_v32, 0.0  ;;  %v966_v2 = vsel %vm958_vm4, %v1601_v63, 0 }
 0x1a0   : > { %v608_v5 = vpop.f32.mrf.mxu0 }
 0x1a1   : > { %1205 = vmatmul.msk.bf16.gmra.mxu2 %vm761_vm3, %v748_v3  ;;  %v609_v7 = vadd.f32 %v1522_v15, %v608_v5  ;;  %v940_v44 = vpack.c.bf16 %v914_v35, %v913_v40 }
 0x1a3   : > { %v698_v9 = vadd.f32 %v697_v4, %v609_v7  ;;  %v978_v47 = vsel %vm958_vm4, %v940_v44, 0  ;;  %v963_v4 = vsel %vm958_vm4, %v1594_v46, 0 }
 0x1a4   : > { %v853_v6 = vpop.f32.mrf.mxu2 }
 0x1a5   : > { %v732_v14 = vmax.f32 %v698_v9, 0.0 }
 0x1a8   : > { %v610_v8 = vpop.f32.mrf.mxu0 }
 0x1a9   : > { %v611_v10 = vadd.f32 %v1522_v15, %v610_v8  ;;  %v854_v15 = vadd.f32 %v1588_v30, %v853_v6 }
 0x1ab   : > { %v700_v12 = vadd.f32 %v699_v11, %v611_v10  ;;  %v915_v31 = vmax.f32 %v854_v15, 0.0 }
 0x1ac   : > { %v855_v13 = vpop.f32.mrf.mxu2 }
 0x1ad   : > { %v733_v16 = vmax.f32 %v700_v12, 0.0  ;;  %v856_v23 = vadd.f32 %v1588_v30, %v855_v13 }
 0x1af   : > { %v749_v17 = vpack.c.bf16 %v733_v16, %v732_v14  ;;  %v916_v27 = vmax.f32 %v856_v23, 0.0 }
 0x1b1   : > { %1206 = vmatmul.msk.bf16.gmra.mxu2 %vm761_vm3, %v749_v17  ;;  %v941_v33 = vpack.c.bf16 %v916_v27, %v915_v31  ;;  %v951_v31 = vld [vmem:[%s1721_s5] sm:$0x3] }
 0x1b3   : > { %v981_v38 = vsel %vm958_vm4, %v941_v33, 0 }
 0x1b4   : > { %v858_v19 = vpop.f32.mrf.mxu2 }
 0x1b5   : > { %v859_v20 = vadd.f32 %v1588_v30, %v858_v19 }
 0x1b7   : > { %v917_v24 = vmax.f32 %v859_v20, 0.0 }
 0x1bc   : > { %v860_v21 = vpop.f32.mrf.mxu2 }
 0x1bd   : > { %v861_v22 = vadd.f32 %v1588_v30, %v860_v21 }
 0x1bf   : > { %v918_v25 = vmax.f32 %v861_v22, 0.0 }
 0x1c1   : > { %v942_v26 = vpack.c.bf16 %v918_v25, %v917_v24 }
 0x1c3   : > { %v984_v28 = vsel %vm958_vm4, %v942_v26, 0 }
 0x1c4   : > { %v863_v29 = vpop.f32.mrf.mxu2  ;;  %1010 = vmatpush.bf16.xpose.msra.mxu3 %v984_v28 }
 0x1c5   : > { %v864_v37 = vadd.f32 %v1588_v30, %v863_v29 }
 0x1c7   : > { %v919_v42 = vmax.f32 %v864_v37, 0.0 }
 0x1cc   : > { %v865_v39 = vpop.f32.mrf.mxu2  ;;  %1011 = vmatpush.bf16.xpose.msra.mxu3 %v981_v38 }
 0x1cd   : > { %v866_v41 = vadd.f32 %v1588_v30, %v865_v39 }
 0x1cf   : > { %v920_v43 = vmax.f32 %v866_v41, 0.0 }
 0x1d1   : > { %v1638_v45 = vpack.c.bf16 %v920_v43, %v919_v42  ;;  %v1335_v43 = vmov 0  }
 0x1d2   : > { %1268 = vset.pattern.permute.xlu0 %v1335_v43 }
 0x1d4   : > { %v868_v48 = vpop.f32.mrf.mxu2  ;;  %1012 = vmatpush.bf16.xpose.msra.mxu3 %v978_v47 }
 0x1d5   : > { %v869_v49 = vadd.f32 %v1588_v30, %v868_v48 }
 0x1d7   : > { %v921_v53 = vmax.f32 %v869_v49, 0.0  ;;  %v987_v49 = vsel %vm958_vm4, %v1638_v45, 0 }
 0x1dc   : > { %v870_v51 = vpop.f32.mrf.mxu2  ;;  %1013 = vmatpush.bf16.xpose.msra.mxu3 %v975_v50 }
 0x1dd   : > { %v871_v52 = vadd.f32 %v1588_v30, %v870_v51 }
 0x1df   : > { %v922_v54 = vmax.f32 %v871_v52, 0.0 }
 0x1e1   : > { %v1644_v56 = vpack.c.bf16 %v922_v54, %v921_v53 }
 0x1e3   : > { %v990_v48 = vsel %vm958_vm4, %v1644_v56, 0 }
 0x1e4   : > { %v873_v58 = vpop.f32.mrf.mxu2  ;;  %1014 = vmatpush.bf16.xpose.msra.mxu3 %v972_v57 }
 0x1e5   : > { %v874_v59 = vadd.f32 %v1588_v30, %v873_v58 }
 0x1e7   : > { %v923_v62 = vmax.f32 %v874_v59, 0.0 }
 0x1ec   : > { %v875_v61 = vpop.f32.mrf.mxu2  ;;  %1015 = vmatpush.bf16.xpose.msra.mxu3 %v969_v60 }
 0x1ed   : > { %v876_v55 = vadd.f32 %v1588_v30, %v875_v61 }
 0x1ef   : > { %v924_v0 = vmax.f32 %v876_v55, 0.0 }
 0x1f1   : > { %v945_v1 = vpack.c.bf16 %v924_v0, %v923_v62 }
 0x1f3   : > { %v993_v47 = vsel %vm958_vm4, %v945_v1, 0 }
 0x1f4   : > { %v878_v3 = vpop.f32.mrf.mxu2  ;;  %1016 = vmatpush.bf16.xpose.msra.mxu3 %v966_v2 }
 0x1f5   : > { %v879_v36 = vadd.f32 %v1588_v30, %v878_v3 }
 0x1f7   : > { %v925_v6 = vmax.f32 %v879_v36, 0.0 }
 0x1fc   : > { %v880_v5 = vpop.f32.mrf.mxu2  ;;  %1017 = vmatpush.bf16.xpose.msra.mxu3 %v963_v4 }
 0x1fd   : > { %v881_v18 = vadd.f32 %v1588_v30, %v880_v5 }
 0x1ff   : > { %v926_v7 = vmax.f32 %v881_v18, 0.0 }
 0x201   : > { %v946_v8 = vpack.c.bf16 %v926_v7, %v925_v6 }
 0x203   : > { %1207 = vmatmul.msk.bf16.vlgmr.msra.gmra.mxu3 %vm958_vm4, %v951_v31  ;;  %v996_v44 = vsel %vm958_vm4, %v946_v8, 0 }
 0x204   : > { %v883_v9 = vpop.f32.mrf.mxu2 }
 0x205   : > { %v884_v10 = vadd.f32 %v1588_v30, %v883_v9 }
 0x207   : > { %v927_v12 = vmax.f32 %v884_v10, 0.0 }
 0x20c   : > { %v885_v11 = vpop.f32.mrf.mxu2 }
 0x20d   : > { %v886_v63 = vadd.f32 %v1588_v30, %v885_v11 }
 0x20f   : > { %v928_v13 = vmax.f32 %v886_v63, 0.0 }
 0x211   : > { %v947_v14 = vpack.c.bf16 %v928_v13, %v927_v12 }
 0x213   : > { %v999_v42 = vsel %vm958_vm4, %v947_v14, 0 }
 0x214   : > { %v888_v16 = vpop.f32.mrf.mxu2 }
 0x215   : > { %v889_v35 = vadd.f32 %v1588_v30, %v888_v16 }
 0x217   : > { %v929_v39 = vmax.f32 %v889_v35, 0.0 }
 0x21c   : > { %v890_v17 = vpop.f32.mrf.mxu2 }
 0x21d   : > { %v891_v33 = vadd.f32 %v1588_v30, %v890_v17 }
 0x21f   : > { %v930_v37 = vmax.f32 %v891_v33, 0.0 }
 0x221   : > { %v948_v40 = vpack.c.bf16 %v930_v37, %v929_v39 }
 0x223   : > { %v1002_v41 = vsel %vm958_vm4, %v948_v40, 0 }
 0x224   : > { %v893_v19 = vpop.f32.mrf.mxu2 }
 0x225   : > { %v894_v26 = vadd.f32 %v1588_v30, %v893_v19 }
 0x227   : > { %v931_v32 = vmax.f32 %v894_v26, 0.0 }
 0x22c   : > { %v895_v46 = vpop.f32.mrf.mxu2 }
 0x22d   : > { %v896_v24 = vadd.f32 %v1588_v30, %v895_v46 }
 0x22f   : > { %v932_v28 = vmax.f32 %v896_v24, 0.0 }
 0x231   : > { %v949_v34 = vpack.c.bf16 %v932_v28, %v931_v32 }
 0x233   : > { %v1005_v38 = vsel %vm958_vm4, %v949_v34, 0 }
 0x234   : > { %v898_v20 = vpop.f32.mrf.mxu2 }
 0x235   : > { %v899_v21 = vadd.f32 %v1588_v30, %v898_v20 }
 0x237   : > { %v933_v25 = vmax.f32 %v899_v21, 0.0 }
 0x23c   : > { %v900_v22 = vpop.f32.mrf.mxu2 }
 0x23d   : > { %v901_v23 = vadd.f32 %v1588_v30, %v900_v22  ;;  %v952_v30 = vld [vmem:[%s1722_s6] sm:$0xf] }
 0x23e   : > { %955 = vperm.xlu0 %1268, %v952_v30  }
 0x23f   : > { %v934_v15 = vmax.f32 %v901_v23, 0.0 }
 0x241   : > { %v950_v27 = vpack.c.bf16 %v934_v15, %v933_v25 }
 0x243   : > { %v1008_v29 = vsel %vm958_vm4, %v950_v27, 0 }
 0x244   : > { %1023 = vmatpush.bf16.xpose.msrb.mxu3 %v1008_v29 }
 0x24c   : > { %1024 = vmatpush.bf16.xpose.msrb.mxu3 %v1005_v38 }
 0x254   : > { %1025 = vmatpush.bf16.xpose.msrb.mxu3 %v1002_v41 }
 0x25c   : > { %1026 = vmatpush.bf16.xpose.msrb.mxu3 %v999_v42 }
 0x264   : > { %1027 = vmatpush.bf16.xpose.msrb.mxu3 %v996_v44 }
 0x26c   : > { %1028 = vmatpush.bf16.xpose.msrb.mxu3 %v993_v47 }
 0x274   : > { %1029 = vmatpush.bf16.xpose.msrb.mxu3 %v990_v48 }
 0x27c   : > { %1030 = vmatpush.bf16.xpose.msrb.mxu3 %v987_v49 }
 0x283   : > { %1208 = vmatmul.msk.bf16.vlgmr.msrb.gmra.mxu3 %vm958_vm4, %v951_v31 }
 0x286   : > { %v1019_v50 = vpop.f32.mrf.mxu3 }
 0x28e   : > { %v1021_v51 = vpop.f32.mrf.mxu3 }
 0x2b0   : > { %v956_v52 = vpop.permute.xlu0 %955 }
 0x2b1   : > { %v1020_v45 = vadd.f32 %v1019_v50, %v956_v52 }
 0x306   : > { %v1032_v53 = vpop.f32.mrf.mxu3 }
 0x307   : > { %v1033_v54 = vadd.f32 %v1032_v53, %v956_v52 }
 0x309   : > { %v1038_v56 = vrot.slane %v1033_v54, 4 }
 0x30b   : > { %v1040_v57 = vsel %vm1039_vm5, %v1020_v45, %v1038_v56 }
 0x30c   : > { %1042 = vst [vmem:[%s274_s19] sm:$0xff] %v1040_v57 }
 0x30d   : > { %1298 = shalt.err (!%p1295_p3)
}
 0x30e   : > { %1228 = dma.vmem_to_hbm [thread:$0]  (%p1414_p5), %s1058_s20, 128, %s1060_s16, %s1044_s21   ;;  %v1034_v58 = vpop.f32.mrf.mxu3 }
 0x30f PF: > { %p1234_p4 = scmp.ge.s32.totalorder %s1333_s27, 2  ;;  %s1071_s9 = sand.u32 1, %s1321_s24  }
 0x310   : > { %s1072_s17 = scalar_lea.sflag [#allocation3], %s1071_s9 }
 0x311   : > { %p1231_p7 = pnand %p1234_p4, %p1418_p6 }
 0x313   : > { %p1232_p8 = pneg %p1231_p7 }
 0x315   : > { %1316 = dma.done.wait (%p1232_p8), %s1072_s17, 128  }
 0x316   : > { %1318 = vsyncadd (%p1232_p8), %s1072_s17, 4294967168  ;;  %p17_p9 = scmp.ge.s32.totalorder %s1401_s30, 4   ;;  %s1726_s24 = smov %s1325_s25 }
 0x317   : > { %s1727_s25 = smov %s1329_s26  ;;  %s1728_s26 = smov %s1412_s10 }
 0x318   : > { %s1729_s27 = smov %s1401_s30  ;;  %19 = sbr.rel (!%p17_p9) target bundleno = 3 (0x3), region = 83 }
 0x31d   :  { %1078 = vsyncpa [#allocation3], 1 }
 0x31e   :  { %1080 = vsyncpa [#allocation3 + $0x1], 1 }

</bundles_post_ra>
